<compile_context>
chip_gen: v5e
topology: v5e:2x2
jax: 0.10.0
libtpu: 0.0.40
codegen_flags: <defaults>
</compile_context>

<pallas_src>
import math

import jax
import jax.numpy as jnp
from jax import lax
from jax.experimental import pallas as pl
from jax.experimental.pallas import tpu as pltpu

_VMEM_LIMIT = 48 * 1024 * 1024  # fits v7x (64 MiB phys), generous on v5e/v6e


def _round_up(x, m):
    return ((x + m - 1) // m) * m


def _pick_tile(dim, candidates):
    """Largest candidate tile (multiple of 128) dividing the 128-padded dim."""
    padded = _round_up(max(dim, 1), 128)
    for c in candidates:
        if padded % c == 0:
            return c
    return 128


# ----------------------------------------------------------------------------
# Pass 1: d = rsqrt(rowsum(adj) + 1)      (the +1 is the folded identity)
# ----------------------------------------------------------------------------
def _degree_kernel(adj_ref, d_ref):
    k = pl.program_id(1)

    @pl.when(k == 0)
    def _():
        d_ref[...] = jnp.zeros_like(d_ref)

    d_ref[...] += jnp.sum(adj_ref[...].astype(jnp.float32), axis=1,
                          keepdims=True)

    @pl.when(k == pl.num_programs(1) - 1)
    def _():
        # deg >= 1 for non-negative adj because of the folded +I.
        d_ref[...] = lax.rsqrt(d_ref[...] + 1.0)


# ----------------------------------------------------------------------------
# Pass 2: SS = d * (X @ W)
# ----------------------------------------------------------------------------
def _support_kernel(x_ref, w_ref, d_ref, ss_ref):
    s = jnp.dot(x_ref[...], w_ref[...], preferred_element_type=jnp.float32)
    ss_ref[...] = d_ref[...] * s


# ----------------------------------------------------------------------------
# Pass 3: out = d_i * (adj @ SS + SS) + bias
# ----------------------------------------------------------------------------
def _agg_kernel(d_ref, adj_ref, ssk_ref, ssi_ref, b_ref, out_ref, acc_ref):
    @pl.when(pl.program_id(2) == 0)
    def _():
        acc_ref[...] = jnp.zeros_like(acc_ref)

    a = adj_ref[...].astype(jnp.float32)
    acc_ref[...] += jnp.dot(a, ssk_ref[...],
                            preferred_element_type=jnp.float32)

    @pl.when(pl.program_id(2) == pl.num_programs(2) - 1)
    def _():
        out = d_ref[...] * (acc_ref[...] + ssi_ref[...]) + b_ref[...]
        out_ref[...] = out.astype(out_ref.dtype)


# ----------------------------------------------------------------------------
# Wrapper
# ----------------------------------------------------------------------------
def graph_convolution(x, adj, weight, bias=None, *, adj_bf16=False):
    """GCN forward. x:(N,F_in) f32, adj:(N,N) f32, weight:(F_in,F_out), bias:(F_out,)."""
    n, f_in = x.shape
    f_out = weight.shape[1]

    tile_n = _pick_tile(n, (512, 384, 256, 128))
    tile_f = _pick_tile(f_out, (256, 128))

    n_pad = _round_up(n, tile_n)
    f_pad = _round_up(f_out, tile_f)

    # Zero-padding is mathematically inert (see header comment).
    x_p = jnp.pad(x, ((0, n_pad - n), (0, 0)))
    adj_p = jnp.pad(adj, ((0, n_pad - n), (0, n_pad - n)))
    w_p = jnp.pad(weight, ((0, 0), (0, f_pad - f_out)))
    b_full = bias if bias is not None else jnp.zeros((f_out,), jnp.float32)
    b_p = jnp.pad(b_full, (0, f_pad - f_out)).reshape(1, f_pad)

    if adj_bf16:
        # Exact for 0/1 adjacency; halves HBM bytes on the bandwidth-bound
        # aggregation stream. Keep f32 (default) for arbitrary edge weights.
        adj_p = adj_p.astype(jnp.bfloat16)

    gi = n_pad // tile_n
    gj = f_pad // tile_f
    gk = n_pad // tile_n

    # ---- pass 1: degree / normalization vector -----------------------------
    d_inv_sqrt = pl.pallas_call(
        _degree_kernel,
        out_shape=jax.ShapeDtypeStruct((n_pad, 1), jnp.float32),
        grid=(gi, gk),
        in_specs=[pl.BlockSpec((tile_n, tile_n), lambda i, k: (i, k))],
        out_specs=pl.BlockSpec((tile_n, 1), lambda i, k: (i, 0)),
        compiler_params=pltpu.CompilerParams(
            dimension_semantics=("parallel", "arbitrary"),
            vmem_limit_bytes=_VMEM_LIMIT),
    )(adj_p)

    # ---- pass 2: scaled support SS = d * (X @ W) ----------------------------
    ss = pl.pallas_call(
        _support_kernel,
        out_shape=jax.ShapeDtypeStruct((n_pad, f_pad), jnp.float32),
        grid=(gi, gj),
        in_specs=[
            pl.BlockSpec((tile_n, f_in), lambda i, j: (i, 0)),   # X
            pl.BlockSpec((f_in, tile_f), lambda i, j: (0, j)),   # W
            pl.BlockSpec((tile_n, 1), lambda i, j: (i, 0)),      # d
        ],
        out_specs=pl.BlockSpec((tile_n, tile_f), lambda i, j: (i, j)),
        compiler_params=pltpu.CompilerParams(
            dimension_semantics=("parallel", "parallel"),
            vmem_limit_bytes=_VMEM_LIMIT),
    )(x_p, w_p, d_inv_sqrt)

    # ---- pass 3: out = d * (adj @ SS + SS) + bias ---------------------------
    out_p = pl.pallas_call(
        _agg_kernel,
        out_shape=jax.ShapeDtypeStruct((n_pad, f_pad), jnp.float32),
        grid=(gi, gj, gk),
        in_specs=[
            pl.BlockSpec((tile_n, 1), lambda i, j, k: (i, 0)),        # d_i
            pl.BlockSpec((tile_n, tile_n), lambda i, j, k: (i, k)),   # adj tile
            pl.BlockSpec((tile_n, tile_f), lambda i, j, k: (k, j)),   # SS (rhs)
            pl.BlockSpec((tile_n, tile_f), lambda i, j, k: (i, j)),   # SS (+I fold)
            pl.BlockSpec((1, tile_f), lambda i, j, k: (0, j)),        # bias
        ],
        out_specs=pl.BlockSpec((tile_n, tile_f), lambda i, j, k: (i, j)),
        scratch_shapes=[pltpu.VMEM((tile_n, tile_f), jnp.float32)],
        compiler_params=pltpu.CompilerParams(
            dimension_semantics=("parallel", "parallel", "arbitrary"),
            vmem_limit_bytes=_VMEM_LIMIT),
    )(d_inv_sqrt, adj_p, ss, ss, b_p)

    return out_p[:n, :f_out]


if __name__ == "__main__":
    # Small synthetic problem: N=8 nodes, in_features=16, out_features=32.
    N, F_IN, F_OUT = 8, 16, 32

    key = jax.random.PRNGKey(0)
    k_x, k_adj, k_w, k_b = jax.random.split(key, 4)

    x = jax.random.normal(k_x, (N, F_IN), dtype=jnp.float32)

    # random symmetric binary adjacency (no self loops; kernel folds in +I)
    a = (jax.random.uniform(k_adj, (N, N)) > 0.6).astype(jnp.float32)
    adj = jnp.clip(a + a.T, 0.0, 1.0)
    adj = adj * (1.0 - jnp.eye(N, dtype=jnp.float32))

    # parameter init mirroring reset_parameters(): uniform(-stdv, stdv)
    stdv = 1.0 / math.sqrt(F_OUT)
    weight = jax.random.uniform(k_w, (F_IN, F_OUT), jnp.float32, -stdv, stdv)
    bias = jax.random.uniform(k_b, (F_OUT,), jnp.float32, -stdv, stdv)

    # adjacency is binary -> bf16 adj stream is exact
    out = graph_convolution(x, adj, weight, bias, adj_bf16=True)
    out = jax.block_until_ready(out)

    # pure-JAX reference of the original module's math
    adj_hat = adj + jnp.eye(N, dtype=jnp.float32)
    d = jnp.power(jnp.sum(adj_hat, axis=1), -0.5)
    adj_norm = d[:, None] * adj_hat * d[None, :]
    ref = adj_norm @ (x @ weight) + bias

    assert out.shape == (N, F_OUT)
    assert jnp.allclose(out, ref, atol=1e-5, rtol=1e-5)

    print("KERNEL_OK")
</pallas_src>

<mosaic_0001>
module attributes {stable_mosaic.version = 11 : i64} {
  func.func @_degree_kernel(%arg0: i32, %arg1: i32, %arg2: memref<128x128xbf16, #tpu.memory_space<vmem>>, %arg3: memref<128x1xf32, #tpu.memory_space<vmem>>) attributes {dimension_semantics = [#tpu.dimension_semantics<parallel>, #tpu.dimension_semantics<arbitrary>], iteration_bounds = array<i64: 1, 1>, scalar_prefetch = 0 : i64, scratch_operands = 0 : i64, tpu.core_type = #tpu.core_type<tc>, window_params = [{transform_indices = @transform_0, window_bounds = array<i64: 128, 128>}, {transform_indices = @transform_1, window_bounds = array<i64: 128, 1>}]} {
    %c0_i32 = arith.constant 0 : i32
    %0 = arith.cmpi eq, %arg1, %c0_i32 : i32
    %1 = arith.extui %0 : i1 to i32
    %c0_i32_0 = arith.constant 0 : i32
    %2 = arith.cmpi ne, %1, %c0_i32_0 : i32
    scf.if %2 {
      %cst_8 = arith.constant 0.000000e+00 : f32
      %13 = vector.broadcast %cst_8 : f32 to vector<128x1xf32>
      %c0_9 = arith.constant 0 : index
      %c0_10 = arith.constant 0 : index
      %14 = vector.load %arg3[%c0_9, %c0_10] : memref<128x1xf32, #tpu.memory_space<vmem>>, vector<128x1xf32>
      tpu.vector_store %arg3[%c0_9, %c0_10], %13 {strides = array<i32>} : memref<128x1xf32, #tpu.memory_space<vmem>>, vector<128x1xf32>,
    } else {
    }
    %c0 = arith.constant 0 : index
    %c0_1 = arith.constant 0 : index
    %3 = vector.load %arg3[%c0, %c0_1] : memref<128x1xf32, #tpu.memory_space<vmem>>, vector<128x1xf32>
    %c0_2 = arith.constant 0 : index
    %c0_3 = arith.constant 0 : index
    %4 = vector.load %arg2[%c0_2, %c0_3] : memref<128x128xbf16, #tpu.memory_space<vmem>>, vector<128x128xbf16>
    %5 = arith.extf %4 : vector<128x128xbf16> to vector<128x128xf32>
    %cst = arith.constant dense<0.000000e+00> : vector<128xf32>
    %6 = vector.multi_reduction <add>, %5, %cst [1] : vector<128x128xf32> to vector<128xf32>
    %7 = vector.shape_cast %6 : vector<128xf32> to vector<128x1xf32>
    %8 = arith.addf %3, %7 : vector<128x1xf32>
    %c0_4 = arith.constant 0 : index
    %c0_5 = arith.constant 0 : index
    %9 = vector.load %arg3[%c0_4, %c0_5] : memref<128x1xf32, #tpu.memory_space<vmem>>, vector<128x1xf32>
    tpu.vector_store %arg3[%c0_4, %c0_5], %8 {strides = array<i32>} : memref<128x1xf32, #tpu.memory_space<vmem>>, vector<128x1xf32>,
    %c0_i32_6 = arith.constant 0 : i32
    %10 = arith.cmpi eq, %arg1, %c0_i32_6 : i32
    %11 = arith.extui %10 : i1 to i32
    %c0_i32_7 = arith.constant 0 : i32
    %12 = arith.cmpi ne, %11, %c0_i32_7 : i32
    scf.if %12 {
      %c0_8 = arith.constant 0 : index
      %c0_9 = arith.constant 0 : index
      %13 = vector.load %arg3[%c0_8, %c0_9] : memref<128x1xf32, #tpu.memory_space<vmem>>, vector<128x1xf32>
      %cst_10 = arith.constant 1.000000e+00 : f32
      %14 = vector.broadcast %cst_10 : f32 to vector<128x1xf32>
      %15 = arith.addf %13, %14 : vector<128x1xf32>
      %16 = math.rsqrt %15 : vector<128x1xf32>
      %c0_11 = arith.constant 0 : index
      %c0_12 = arith.constant 0 : index
      %17 = vector.load %arg3[%c0_11, %c0_12] : memref<128x1xf32, #tpu.memory_space<vmem>>, vector<128x1xf32>
      tpu.vector_store %arg3[%c0_11, %c0_12], %16 {strides = array<i32>} : memref<128x1xf32, #tpu.memory_space<vmem>>, vector<128x1xf32>,
    } else {
    }
    return
  }
  func.func @transform_0(%arg0: i32, %arg1: i32) -> (i32, i32) {
    %c0_i32 = arith.constant 0 : i32
    return %arg0, %arg1 : i32, i32
  }
  func.func @transform_1(%arg0: i32, %arg1: i32) -> (i32, i32) {
    %c0_i32 = arith.constant 0 : i32
    %c0_i32_0 = arith.constant 0 : i32
    return %arg0, %c0_i32 : i32, i32
  }
}

</mosaic_0001>

<bundles_post_ra>
// kernel: tpu_custom_call.1
= control target key start
LH: loop header
LB: loop body
LE: loop exit
PB: predicated region body
PF: predicated region fallthrough
CT: control target
= control target key end

     0   :  { %6 = vsyncpa [#allocation3], 0  ;;  %s475_s9 = smov [#allocation2]   ;;  %s476_s11 = smov 64   ;;  %s948_s0 = inlined_call_operand.hbm [shape: bf16[128,128], index: 0, kind: input, shape index: {}]   ;;  %s949_s1 = inlined_call_operand.vmem [shape: f32[128,1], index: 1, kind: output, shape index: {}]  }
   0x1   :  { %s11_s8 = sshll.u32 %s948_s0, 4  ;;  %s13_s10 = sshll.u32 %s475_s9, 4  ;;  %s12_s8 = int_to_ptr.hbm [resolvable:$true] %s11_s8  ;;  %s14_s10 = int_to_ptr.vmem [resolvable:$true] %s13_s10 }
   0x2   :  { %s477_s12 = smov 4  }
   0x3   :  { %19 = dma.hbm_to_vmem [thread:$0]  %s12_s8, 1024, %s14_s10, [#allocation3], %s476_s11, %s476_s11, %s477_s12  }
   0x4   :  { %473 = dma.done.wait [#allocation3], 1024  }
   0x5   :  { %474 = vsyncadd [#allocation3], 4294966272  ;;  %v407_v0 = vld [vmem:[#allocation2 + $0x10] sm:$0xff]   ;;  %v406_v1 = vld [vmem:[#allocation2 + $0x8] sm:$0xff]   ;;  %vm28_vm0 = vcmask 7168   ;;  %v478_v11 = vmov 0.0  }
   0x6   :  { %v375_v2 = vld [vmem:[#allocation2] sm:$0xff]   ;;  %v384_v3 = vunpack.c.l.bf16 %v407_v0  ;;  %v380_v4 = vunpack.c.l.bf16 %v406_v1  ;;  %v385_v6 = vunpack.c.h.bf16 %v407_v0  ;;  %v381_v7 = vunpack.c.h.bf16 %v406_v1  ;;  %v408_v10 = vld [vmem:[#allocation2 + $0x18] sm:$0xff]   ;;  %33 = vst.msk [vmem:[%s949_s1 + $0x20] sm:$0xff] %vm28_vm0, %v478_v11  ;;  %v410_v15 = vld [vmem:[#allocation2 + $0x28] sm:$0xff]  }
   0x7   :  { %v376_v5 = vunpack.c.l.bf16 %v375_v2  ;;  %v377_v8 = vunpack.c.h.bf16 %v375_v2  ;;  %v409_v9 = vld [vmem:[#allocation2 + $0x20] sm:$0xff]   ;;  %29 = vst.msk [vmem:[%s949_s1] sm:$0xff] %vm28_vm0, %v478_v11  ;;  %v389_v13 = vunpack.c.h.bf16 %v408_v10  ;;  %v388_v14 = vunpack.c.l.bf16 %v408_v10  ;;  %v412_v19 = vld [vmem:[#allocation2 + $0x38] sm:$0xff]   ;;  %v411_v20 = vld [vmem:[#allocation2 + $0x30] sm:$0xff]  }
   0x8   :  { %101 = vadd.xlane.f32.xlu2 %v384_v3  ;;  %97 = vadd.xlane.f32.xlu1 %v380_v4  ;;  %v392_v12 = vunpack.c.l.bf16 %v409_v9  ;;  %30 = vst.msk [vmem:[%s949_s1 + $0x8] sm:$0xff] %vm28_vm0, %v478_v11  ;;  %v397_v16 = vunpack.c.h.bf16 %v410_v15  ;;  %v396_v17 = vunpack.c.l.bf16 %v410_v15  ;;  %v393_v18 = vunpack.c.h.bf16 %v409_v9 }
   0x9   :  { %93 = vadd.xlane.f32.xlu0 %v376_v5  ;;  %31 = vst.msk [vmem:[%s949_s1 + $0x10] sm:$0xff] %vm28_vm0, %v478_v11  ;;  %v404_v21 = vunpack.c.l.bf16 %v412_v19  ;;  %v401_v22 = vunpack.c.h.bf16 %v411_v20  ;;  %v400_v23 = vunpack.c.l.bf16 %v411_v20  ;;  %v405_v24 = vunpack.c.h.bf16 %v412_v19 }
   0xa   :  { %32 = vst.msk [vmem:[%s949_s1 + $0x18] sm:$0xff] %vm28_vm0, %v478_v11 }
   0xb   :  { %34 = vst.msk [vmem:[%s949_s1 + $0x28] sm:$0xff] %vm28_vm0, %v478_v11 }
   0xc   :  { %35 = vst.msk [vmem:[%s949_s1 + $0x30] sm:$0xff] %vm28_vm0, %v478_v11 }
   0xd   :  { %36 = vst.msk [vmem:[%s949_s1 + $0x38] sm:$0xff] %vm28_vm0, %v478_v11  ;;  %v49_v25 = vld [vmem:[%s949_s1 + $0x20] sm:$0xff] }
   0xe   :  { %37 = vst.msk [vmem:[%s949_s1 + $0x40] sm:$0xff] %vm28_vm0, %v478_v11  ;;  %v45_v27 = vld [vmem:[%s949_s1] sm:$0xff] }
   0xf   :  { %38 = vst.msk [vmem:[%s949_s1 + $0x48] sm:$0xff] %vm28_vm0, %v478_v11  ;;  %v46_v36 = vld [vmem:[%s949_s1 + $0x8] sm:$0xff] }
  0x10   :  { %103 = vadd.xlane.f32.xlu2 %v385_v6  ;;  %99 = vadd.xlane.f32.xlu1 %v381_v7  ;;  %39 = vst.msk [vmem:[%s949_s1 + $0x50] sm:$0xff] %vm28_vm0, %v478_v11  ;;  %v47_v26 = vld [vmem:[%s949_s1 + $0x10] sm:$0xff] }
  0x11   :  { %95 = vadd.xlane.f32.xlu0 %v377_v8  ;;  %40 = vst.msk [vmem:[%s949_s1 + $0x58] sm:$0xff] %vm28_vm0, %v478_v11  ;;  %v48_v35 = vld [vmem:[%s949_s1 + $0x18] sm:$0xff] }
  0x12   :  { %41 = vst.msk [vmem:[%s949_s1 + $0x60] sm:$0xff] %vm28_vm0, %v478_v11  ;;  %v50_v34 = vld [vmem:[%s949_s1 + $0x28] sm:$0xff] }
  0x13   :  { %42 = vst.msk [vmem:[%s949_s1 + $0x68] sm:$0xff] %vm28_vm0, %v478_v11  ;;  %v51_v51 = vld [vmem:[%s949_s1 + $0x30] sm:$0xff] }
  0x14   :  { %43 = vst.msk [vmem:[%s949_s1 + $0x70] sm:$0xff] %vm28_vm0, %v478_v11  ;;  %v52_v50 = vld [vmem:[%s949_s1 + $0x38] sm:$0xff] }
  0x15   :  { %44 = vst.msk [vmem:[%s949_s1 + $0x78] sm:$0xff] %vm28_vm0, %v478_v11  ;;  %v53_v49 = vld [vmem:[%s949_s1 + $0x40] sm:$0xff] }
  0x16   :  { %v54_v10 = vld [vmem:[%s949_s1 + $0x48] sm:$0xff] }
  0x17   :  { %v55_v9 = vld [vmem:[%s949_s1 + $0x50] sm:$0xff] }
  0x18   :  { %109 = vadd.xlane.f32.xlu2 %v392_v12  ;;  %107 = vadd.xlane.f32.xlu1 %v389_v13  ;;  %v56_v6 = vld [vmem:[%s949_s1 + $0x58] sm:$0xff] }
  0x19   :  { %105 = vadd.xlane.f32.xlu0 %v388_v14 }
  0x20   :  { %115 = vadd.xlane.f32.xlu2 %v397_v16  ;;  %113 = vadd.xlane.f32.xlu1 %v396_v17 }
  0x21   :  { %111 = vadd.xlane.f32.xlu0 %v393_v18 }
  0x28   :  { %121 = vadd.xlane.f32.xlu2 %v404_v21  ;;  %119 = vadd.xlane.f32.xlu1 %v401_v22 }
  0x29   :  { %117 = vadd.xlane.f32.xlu0 %v400_v23 }
  0x31   :  { %123 = vadd.xlane.f32.xlu0 %v405_v24 }
  0x7b   :  { %v102_v28 = vpop.xlane.xlu2 %101  ;;  %v98_v29 = vpop.xlane.xlu1 %97 }
  0x7c   :  { %v129_v30 = vadd.f32 %v102_v28, %v49_v25  ;;  %v127_v31 = vadd.f32 %v98_v29, %v47_v26  ;;  %v94_v32 = vpop.xlane.xlu0 %93 }
  0x7d   :  { %v125_v33 = vadd.f32 %v94_v32, %v45_v27 }
  0x7e   :  { %146 = vst.msk [vmem:[%s949_s1 + $0x20] sm:$0xff] %vm28_vm0, %v129_v30 }
  0x7f   :  { %144 = vst.msk [vmem:[%s949_s1 + $0x10] sm:$0xff] %vm28_vm0, %v127_v31 }
  0x80   :  { %142 = vst.msk [vmem:[%s949_s1] sm:$0xff] %vm28_vm0, %v125_v33 }
  0x83   :  { %v104_v37 = vpop.xlane.xlu2 %103  ;;  %v100_v38 = vpop.xlane.xlu1 %99 }
  0x84   :  { %v130_v39 = vadd.f32 %v104_v37, %v50_v34  ;;  %v128_v40 = vadd.f32 %v100_v38, %v48_v35  ;;  %v96_v41 = vpop.xlane.xlu0 %95 }
  0x85   :  { %v165_v42 = vld [vmem:[%s949_s1 + $0x20] sm:$0xff]  ;;  %v126_v43 = vadd.f32 %v96_v41, %v46_v36 }
  0x86   :  { %v589_v44 = vadd.f32 1.0, %v165_v42  ;;  %v163_v45 = vld [vmem:[%s949_s1 + $0x10] sm:$0xff]  ;;  %147 = vst.msk [vmem:[%s949_s1 + $0x28] sm:$0xff] %vm28_vm0, %v130_v39 }
  0x87   :  { %v598_v46 = vadd.f32 1.0, %v163_v45  ;;  %v161_v47 = vld [vmem:[%s949_s1] sm:$0xff]  ;;  %145 = vst.msk [vmem:[%s949_s1 + $0x18] sm:$0xff] %vm28_vm0, %v128_v40  ;;  %v59_v42 = vld [vmem:[%s949_s1 + $0x70] sm:$0xff] }
  0x88   :  { %417 = vrsqrt.f32 %v589_v44  ;;  %v608_v48 = vadd.f32 1.0, %v161_v47  ;;  %143 = vst.msk [vmem:[%s949_s1 + $0x8] sm:$0xff] %vm28_vm0, %v126_v43  ;;  %vm239_vm1 = vweird.f32 %v589_v44 }
  0x89   :  { %419 = vrsqrt.f32 %v598_v46  ;;  %vm219_vm3 = vweird.f32 %v598_v46 }
  0x8a   :  { %421 = vrsqrt.f32 %v608_v48  ;;  %vm199_vm7 = vweird.f32 %v608_v48 }
  0x8b   :  { %v110_v52 = vpop.xlane.xlu2 %109  ;;  %v108_v53 = vpop.xlane.xlu1 %107 }
  0x8c   :  { %v133_v54 = vadd.f32 %v110_v52, %v53_v49  ;;  %v132_v55 = vadd.f32 %v108_v53, %v52_v50  ;;  %v106_v56 = vpop.xlane.xlu0 %105  ;;  %v57_v49 = vld [vmem:[%s949_s1 + $0x60] sm:$0xff] }
  0x8d   :  { %v166_v57 = vld [vmem:[%s949_s1 + $0x28] sm:$0xff]  ;;  %v131_v58 = vadd.f32 %v106_v56, %v51_v51 }
  0x8e   :  { %v628_v59 = vpop.eup %417  ;;  %v630_v60 = vadd.f32 1.0, %v166_v57  ;;  %v164_v61 = vld [vmem:[%s949_s1 + $0x18] sm:$0xff]  ;;  %150 = vst.msk [vmem:[%s949_s1 + $0x40] sm:$0xff] %vm28_vm0, %v133_v54 }
  0x8f   :  { %v639_v62 = vpop.eup %419  ;;  %v234_v63 = vmul.f32 %v628_v59, %v589_v44  ;;  %v643_v0 = vadd.f32 1.0, %v164_v61  ;;  %v162_v1 = vld [vmem:[%s949_s1 + $0x8] sm:$0xff]  ;;  %149 = vst.msk [vmem:[%s949_s1 + $0x38] sm:$0xff] %vm28_vm0, %v132_v55  ;;  %vm240_vm2 = vweird.f32 %v628_v59 }
  0x90   :  { %v652_v2 = vpop.eup %421  ;;  %v214_v3 = vmul.f32 %v639_v62, %v598_v46  ;;  %423 = vrsqrt.f32 %v630_v60  ;;  %148 = vst.msk [vmem:[%s949_s1 + $0x30] sm:$0xff] %vm28_vm0, %v131_v58  ;;  %v669_v8 = vadd.f32 1.0, %v162_v1  ;;  %vm220_vm4 = vweird.f32 %v639_v62  ;;  %vm241_vm6 = vmor %vm239_vm1, %vm240_vm2 }
  0x91   :  { %v235_v4 = vmul.f32 %v628_v59, %v234_v63  ;;  %v194_v5 = vmul.f32 %v652_v2, %v608_v48  ;;  %425 = vrsqrt.f32 %v643_v0  ;;  %vm200_vm5 = vweird.f32 %v652_v2  ;;  %vm221_vm8 = vmor %vm219_vm3, %vm220_vm4  ;;  %v58_v48 = vld [vmem:[%s949_s1 + $0x68] sm:$0xff] }
  0x92   :  { %v215_v7 = vmul.f32 %v639_v62, %v214_v3  ;;  %427 = vrsqrt.f32 %v669_v8  ;;  %vm249_vm9 = vweird.f32 %v630_v60  ;;  %vm201_vm10 = vmor %vm199_vm7, %vm200_vm5  ;;  %vm229_vm11 = vweird.f32 %v643_v0 }
  0x93   :  { %v236_v11 = vmul.f32 0.5, %v235_v4  ;;  %v195_v12 = vmul.f32 %v652_v2, %v194_v5  ;;  %v116_v13 = vpop.xlane.xlu2 %115  ;;  %v114_v14 = vpop.xlane.xlu1 %113  ;;  %vm209_vm2 = vweird.f32 %v669_v8 }
  0x94   :  { %v216_v15 = vmul.f32 0.5, %v215_v7  ;;  %v136_v16 = vadd.f32 %v116_v13, %v56_v6  ;;  %v112_v17 = vpop.xlane.xlu0 %111  ;;  %v135_v21 = vadd.f32 %v114_v14, %v55_v9 }
  0x95   :  { %v237_v18 = vsub.f32 1.5, %v236_v11  ;;  %v196_v19 = vmul.f32 0.5, %v195_v12  ;;  %v169_v20 = vld [vmem:[%s949_s1 + $0x40] sm:$0xff]  ;;  %v134_v22 = vadd.f32 %v112_v17, %v54_v10  ;;  %v60_v11 = vld [vmem:[%s949_s1 + $0x78] sm:$0xff] }
  0x96   :  { %v684_v23 = vpop.eup %423  ;;  %v217_v24 = vsub.f32 1.5, %v216_v15  ;;  %v688_v25 = vadd.f32 1.0, %v169_v20  ;;  %153 = vst.msk [vmem:[%s949_s1 + $0x58] sm:$0xff] %vm28_vm0, %v136_v16  ;;  %v168_v30 = vld [vmem:[%s949_s1 + $0x38] sm:$0xff] }
  0x97   :  { %v694_v26 = vpop.eup %425  ;;  %v238_v27 = vmul.f32 %v628_v59, %v237_v18  ;;  %v197_v28 = vsub.f32 1.5, %v196_v19  ;;  %v244_v29 = vmul.f32 %v684_v23, %v630_v60  ;;  %v167_v31 = vld [vmem:[%s949_s1 + $0x30] sm:$0xff]  ;;  %152 = vst.msk [vmem:[%s949_s1 + $0x50] sm:$0xff] %vm28_vm0, %v135_v21  ;;  %v741_v40 = vadd.f32 1.0, %v168_v30 }
  0x98   :  { %v218_v32 = vmul.f32 %v639_v62, %v217_v24  ;;  %v224_v33 = vmul.f32 %v694_v26, %v643_v0  ;;  %429 = vrsqrt.f32 %v688_v25  ;;  %151 = vst.msk [vmem:[%s949_s1 + $0x48] sm:$0xff] %vm28_vm0, %v134_v22  ;;  %v731_v37 = vpop.eup %427  ;;  %v743_v41 = vadd.f32 1.0, %v167_v31 }
  0x99   :  { %v242_v34 = vsel %vm241_vm6, %v628_v59, %v238_v27  ;;  %v198_v35 = vmul.f32 %v652_v2, %v197_v28  ;;  %v245_v36 = vmul.f32 %v684_v23, %v244_v29  ;;  %v204_v45 = vmul.f32 %v731_v37, %v669_v8 }
  0x9a   :  { %357 = vst.msk [vmem:[%s949_s1 + $0x20] sm:$0xff] %vm28_vm0, %v242_v34  ;;  %v222_v38 = vsel %vm221_vm8, %v639_v62, %v218_v32  ;;  %v225_v39 = vmul.f32 %v694_v26, %v224_v33  ;;  %vm250_vm12 = vweird.f32 %v684_v23  ;;  %vm230_vm13 = vweird.f32 %v694_v26 }
  0x9b   :  { %355 = vst.msk [vmem:[%s949_s1 + $0x10] sm:$0xff] %vm28_vm0, %v222_v38  ;;  %v202_v43 = vsel %vm201_vm10, %v652_v2, %v198_v35  ;;  %v246_v44 = vmul.f32 0.5, %v245_v36  ;;  %v122_v46 = vpop.xlane.xlu2 %121  ;;  %v120_v47 = vpop.xlane.xlu1 %119  ;;  %431 = vrsqrt.f32 %v741_v40  ;;  %v205_v53 = vmul.f32 %v731_v37, %v204_v45  ;;  %vm251_vm14 = vmor %vm249_vm9, %vm250_vm12 }
  0x9c   :  { %353 = vst.msk [vmem:[%s949_s1] sm:$0xff] %vm28_vm0, %v202_v43  ;;  %v226_v50 = vmul.f32 0.5, %v225_v39  ;;  %v118_v51 = vpop.xlane.xlu0 %117  ;;  %433 = vrsqrt.f32 %v743_v41  ;;  %v139_v55 = vadd.f32 %v122_v46, %v59_v42  ;;  %v138_v61 = vadd.f32 %v120_v47, %v58_v48  ;;  %vm231_vm1 = vmor %vm229_vm11, %vm230_vm13 }
  0x9d   :  { %v247_v52 = vsub.f32 1.5, %v246_v44  ;;  %v172_v54 = vld [vmem:[%s949_s1 + $0x58] sm:$0xff]  ;;  %v137_v62 = vadd.f32 %v118_v51, %v57_v49  ;;  %v206_v1 = vmul.f32 0.5, %v205_v53  ;;  %vm210_vm15 = vweird.f32 %v731_v37 }
  0x9e   :  { %v774_v56 = vpop.eup %429  ;;  %v227_v57 = vsub.f32 1.5, %v226_v50  ;;  %v776_v58 = vadd.f32 1.0, %v172_v54  ;;  %v171_v59 = vld [vmem:[%s949_s1 + $0x50] sm:$0xff]  ;;  %156 = vst.msk [vmem:[%s949_s1 + $0x70] sm:$0xff] %vm28_vm0, %v139_v55  ;;  %vm211_vm3 = vmor %vm209_vm2, %vm210_vm15  ;;  %vm279_vm4 = vweird.f32 %v688_v25  ;;  %vm269_vm6 = vweird.f32 %v741_v40 }
  0x9f   :  { %v248_v63 = vmul.f32 %v684_v23, %v247_v52  ;;  %v274_v2 = vmul.f32 %v774_v56, %v688_v25  ;;  %v170_v3 = vld [vmem:[%s949_s1 + $0x48] sm:$0xff]  ;;  %v798_v5 = vadd.f32 1.0, %v171_v59  ;;  %155 = vst.msk [vmem:[%s949_s1 + $0x68] sm:$0xff] %vm28_vm0, %v138_v61  ;;  %v207_v60 = vsub.f32 1.5, %v206_v1 }
  0xa0   :  { %v228_v4 = vmul.f32 %v694_v26, %v227_v57  ;;  %435 = vrsqrt.f32 %v776_v58  ;;  %v810_v9 = vadd.f32 1.0, %v170_v3  ;;  %154 = vst.msk [vmem:[%s949_s1 + $0x60] sm:$0xff] %vm28_vm0, %v137_v62  ;;  %vm280_vm5 = vweird.f32 %v774_v56 }
  0xa1   :  { %v252_v6 = vsel %vm251_vm14, %v684_v23, %v248_v63  ;;  %v275_v7 = vmul.f32 %v774_v56, %v274_v2  ;;  %v816_v10 = vpop.eup %431  ;;  %437 = vrsqrt.f32 %v798_v5  ;;  %v208_v13 = vmul.f32 %v731_v37, %v207_v60  ;;  %vm281_vm7 = vmor %vm279_vm4, %vm280_vm5 }
  0xa2   :  { %358 = vst.msk [vmem:[%s949_s1 + $0x28] sm:$0xff] %vm28_vm0, %v252_v6  ;;  %v232_v0 = vsel %vm231_vm1, %v694_v26, %v228_v4  ;;  %v827_v12 = vpop.eup %433  ;;  %v264_v15 = vmul.f32 %v816_v10, %v741_v40  ;;  %439 = vrsqrt.f32 %v810_v9  ;;  %vm270_vm8 = vweird.f32 %v816_v10 }
  0xa3   :  { %356 = vst.msk [vmem:[%s949_s1 + $0x18] sm:$0xff] %vm28_vm0, %v232_v0  ;;  %v276_v14 = vmul.f32 0.5, %v275_v7  ;;  %v254_v16 = vmul.f32 %v827_v12, %v743_v41  ;;  %v212_v18 = vsel %vm211_vm3, %v731_v37, %v208_v13  ;;  %vm259_vm9 = vweird.f32 %v743_v41  ;;  %vm271_vm11 = vmor %vm269_vm6, %vm270_vm8 }
  0xa4   :  { %v124_v17 = vpop.xlane.xlu0 %123  ;;  %v265_v19 = vmul.f32 %v816_v10, %v264_v15  ;;  %354 = vst.msk [vmem:[%s949_s1 + $0x8] sm:$0xff] %vm28_vm0, %v212_v18  ;;  %vm260_vm10 = vweird.f32 %v827_v12  ;;  %vm309_vm12 = vweird.f32 %v776_v58  ;;  %vm299_vm15 = vweird.f32 %v798_v5 }
  0xa5   :  { %v277_v8 = vsub.f32 1.5, %v276_v14  ;;  %v140_v20 = vadd.f32 %v124_v17, %v60_v11  ;;  %v255_v22 = vmul.f32 %v827_v12, %v254_v16  ;;  %v175_v23 = vld [vmem:[%s949_s1 + $0x70] sm:$0xff]  ;;  %vm261_vm14 = vmor %vm259_vm9, %vm260_vm10  ;;  %vm289_vm5 = vweird.f32 %v810_v9 }
  0xa6   :  { %v436_v21 = vpop.eup %435  ;;  %v266_v26 = vmul.f32 0.5, %v265_v19  ;;  %v174_v28 = vld [vmem:[%s949_s1 + $0x68] sm:$0xff]  ;;  %v869_v31 = vadd.f32 1.0, %v175_v23 }
  0xa7   :  { %v278_v24 = vmul.f32 %v774_v56, %v277_v8  ;;  %v304_v27 = vmul.f32 %v436_v21, %v776_v58  ;;  %157 = vst.msk [vmem:[%s949_s1 + $0x78] sm:$0xff] %vm28_vm0, %v140_v20  ;;  %v438_v29 = vpop.eup %437  ;;  %v256_v30 = vmul.f32 0.5, %v255_v22  ;;  %v871_v32 = vadd.f32 1.0, %v174_v28  ;;  %v173_v44 = vld [vmem:[%s949_s1 + $0x60] sm:$0xff] }
  0xa8   :  { %v267_v34 = vsub.f32 1.5, %v266_v26  ;;  %v294_v36 = vmul.f32 %v438_v29, %v798_v5  ;;  %v440_v37 = vpop.eup %439  ;;  %441 = vrsqrt.f32 %v869_v31  ;;  %vm310_vm13 = vweird.f32 %v436_v21 }
  0xa9   :  { %v282_v33 = vsel %vm281_vm7, %v774_v56, %v278_v24  ;;  %v305_v35 = vmul.f32 %v436_v21, %v304_v27  ;;  %v257_v25 = vsub.f32 1.5, %v256_v30  ;;  %v284_v43 = vmul.f32 %v440_v37, %v810_v9  ;;  %vm311_vm2 = vmor %vm309_vm12, %vm310_vm13 }
  0xaa   :  { %361 = vst.msk [vmem:[%s949_s1 + $0x40] sm:$0xff] %vm28_vm0, %v282_v33  ;;  %v268_v38 = vmul.f32 %v816_v10, %v267_v34  ;;  %v295_v42 = vmul.f32 %v438_v29, %v294_v36  ;;  %443 = vrsqrt.f32 %v871_v32  ;;  %vm300_vm1 = vweird.f32 %v438_v29 }
  0xab   :  { %v306_v39 = vmul.f32 0.5, %v305_v35  ;;  %v258_v41 = vmul.f32 %v827_v12, %v257_v25  ;;  %v285_v48 = vmul.f32 %v440_v37, %v284_v43  ;;  %v189_v49 = vadd.f32 1.0, %v173_v44  ;;  %vm301_vm4 = vmor %vm299_vm15, %vm300_vm1 }
  0xac   :  { %v272_v45 = vsel %vm271_vm11, %v816_v10, %v268_v38  ;;  %v296_v47 = vmul.f32 0.5, %v295_v42  ;;  %vm290_vm3 = vweird.f32 %v440_v37  ;;  %vm339_vm7 = vweird.f32 %v869_v31 }
  0xad   :  { %v307_v46 = vsub.f32 1.5, %v306_v39  ;;  %360 = vst.msk [vmem:[%s949_s1 + $0x38] sm:$0xff] %vm28_vm0, %v272_v45  ;;  %v262_v40 = vsel %vm261_vm14, %v827_v12, %v258_v41  ;;  %v286_v53 = vmul.f32 0.5, %v285_v48  ;;  %445 = vrsqrt.f32 %v189_v49  ;;  %vm291_vm6 = vmor %vm289_vm5, %vm290_vm3 }
  0xae   :  { %v176_v50 = vld [vmem:[%s949_s1 + $0x78] sm:$0xff]  ;;  %359 = vst.msk [vmem:[%s949_s1 + $0x30] sm:$0xff] %vm28_vm0, %v262_v40  ;;  %v297_v52 = vsub.f32 1.5, %v296_v47  ;;  %v442_v55 = vpop.eup %441  ;;  %vm329_vm9 = vweird.f32 %v871_v32  ;;  %vm319_vm14 = vweird.f32 %v189_v49 }
  0xaf   :  { %v308_v51 = vmul.f32 %v436_v21, %v307_v46  ;;  %v192_v54 = vadd.f32 1.0, %v176_v50  ;;  %v287_v59 = vsub.f32 1.5, %v286_v53  ;;  %v334_v61 = vmul.f32 %v442_v55, %v869_v31 }
  0xb0   :  { %v298_v57 = vmul.f32 %v438_v29, %v297_v52  ;;  %v444_v62 = vpop.eup %443  ;;  %vm340_vm8 = vweird.f32 %v442_v55 }
  0xb1   :  { %v312_v56 = vsel %vm311_vm2, %v436_v21, %v308_v51  ;;  %447 = vrsqrt.f32 %v192_v54  ;;  %v288_v63 = vmul.f32 %v440_v37, %v287_v59  ;;  %v335_v1 = vmul.f32 %v442_v55, %v334_v61  ;;  %vm341_vm11 = vmor %vm339_vm7, %vm340_vm8 }
  0xb2   :  { %364 = vst.msk [vmem:[%s949_s1 + $0x58] sm:$0xff] %vm28_vm0, %v312_v56  ;;  %v302_v58 = vsel %vm301_vm4, %v438_v29, %v298_v57  ;;  %v324_v2 = vmul.f32 %v444_v62, %v871_v32  ;;  %vm330_vm10 = vweird.f32 %v444_v62  ;;  %vm349_vm2 = vweird.f32 %v192_v54 }
  0xb3   :  { %363 = vst.msk [vmem:[%s949_s1 + $0x50] sm:$0xff] %vm28_vm0, %v302_v58  ;;  %v292_v3 = vsel %vm291_vm6, %v440_v37, %v288_v63  ;;  %v336_v4 = vmul.f32 0.5, %v335_v1  ;;  %v446_v5 = vpop.eup %445  ;;  %vm331_vm12 = vmor %vm329_vm9, %vm330_vm10 }
  0xb4   :  { %v325_v6 = vmul.f32 %v444_v62, %v324_v2  ;;  %362 = vst.msk [vmem:[%s949_s1 + $0x48] sm:$0xff] %vm28_vm0, %v292_v3  ;;  %v314_v9 = vmul.f32 %v446_v5, %v189_v49  ;;  %vm320_vm13 = vweird.f32 %v446_v5 }
  0xb5   :  { %v337_v60 = vsub.f32 1.5, %v336_v4  ;;  %vm321_vm1 = vmor %vm319_vm14, %vm320_vm13 }
  0xb6   :  { %v326_v7 = vmul.f32 0.5, %v325_v6  ;;  %v315_v12 = vmul.f32 %v446_v5, %v314_v9 }
  0xb7   :  { %v448_v10 = vpop.eup %447  ;;  %v338_v0 = vmul.f32 %v442_v55, %v337_v60 }
  0xb8   :  { %v327_v11 = vsub.f32 1.5, %v326_v7  ;;  %v344_v13 = vmul.f32 %v448_v10, %v192_v54  ;;  %v316_v16 = vmul.f32 0.5, %v315_v12  ;;  %vm350_vm15 = vweird.f32 %v448_v10 }
  0xb9   :  { %v342_v14 = vsel %vm341_vm11, %v442_v55, %v338_v0  ;;  %vm351_vm3 = vmor %vm349_vm2, %vm350_vm15 }
  0xba   :  { %v328_v15 = vmul.f32 %v444_v62, %v327_v11  ;;  %v345_v17 = vmul.f32 %v448_v10, %v344_v13  ;;  %367 = vst.msk [vmem:[%s949_s1 + $0x70] sm:$0xff] %vm28_vm0, %v342_v14  ;;  %v317_v8 = vsub.f32 1.5, %v316_v16 }
  0xbc   :  { %v332_v18 = vsel %vm331_vm12, %v444_v62, %v328_v15  ;;  %v346_v19 = vmul.f32 0.5, %v345_v17  ;;  %v318_v20 = vmul.f32 %v446_v5, %v317_v8 }
  0xbd   :  { %366 = vst.msk [vmem:[%s949_s1 + $0x68] sm:$0xff] %vm28_vm0, %v332_v18 }
  0xbe   :  { %v347_v21 = vsub.f32 1.5, %v346_v19  ;;  %v322_v22 = vsel %vm321_vm1, %v446_v5, %v318_v20 }
  0xbf   :  { %365 = vst.msk [vmem:[%s949_s1 + $0x60] sm:$0xff] %vm28_vm0, %v322_v22 }
  0xc0   :  { %v348_v23 = vmul.f32 %v448_v10, %v347_v21 }
  0xc2   :  { %v352_v24 = vsel %vm351_vm3, %v448_v10, %v348_v23 }
  0xc3   :  { %368 = vst.msk [vmem:[%s949_s1 + $0x78] sm:$0xff] %vm28_vm0, %v352_v24 }
  0xc4   :  { %373 = vsyncpa [#allocation3], 1 }

</bundles_post_ra>
